<compile_context>
chip_gen: v6e
topology: v6e:2x2x1
jax: 0.10.0
libtpu: 0.0.40
codegen_flags: <defaults>
</compile_context>

<pallas_src>
import functools

import jax
import jax.numpy as jnp
import numpy as np
from jax.experimental import pallas as pl
from jax.experimental.pallas import tpu as pltpu

P_GROUP = 8          # the module's `p`
EPS = 1e-5           # nn.BatchNorm2d default eps
GAMMA = 1.0          # fresh BatchNorm2d weight (ones)
BETA = 0.0           # fresh BatchNorm2d bias (zeros)
LANES = 128

# Fused fast path: whole (N, p, HW) slab per grid step.  Double-buffered
# input + output plus in-body f32 temporaries keep roughly 6-8 slabs live, so
# a 4 MiB slab cap stays well under the 48 MiB scoped-VMEM request below even
# on v7x (64 MiB physical).
_FUSED_SLAB_BYTES = 4 * 1024 * 1024
# Chunked (two-pass) fallback block byte target (soft).
_CHUNK_BLOCK_BYTES = 4 * 1024 * 1024
# Hard cap for the HW-unaligned case where Mosaic forces the block last dim
# to equal HW (can't chunk it).
_HARD_SLAB_BYTES = 10 * 1024 * 1024
# Explicit scoped-VMEM request: safe on v5e/v6e (128 MiB physical) and leaves
# headroom on v7x (64 MiB physical).
_VMEM_LIMIT_BYTES = 48 * 1024 * 1024


def _choose_blocks(N, p, HW, itemsize, budget):
    """Pick a (n_chunk, d) block = (n_chunk, p, d): n_chunk | N, d | HW.

    Prefer chunking N with full-HW blocks (contiguous DMA runs per sample);
    only chunk HW (multiples of 128) when a single-sample slab exceeds the
    budget.  The budget is a soft target; the floor block always compiles.
    """
    per_n = p * HW * itemsize
    if per_n <= budget:
        n_chunk = 1
        for cand in range(1, N + 1):
            if N % cand == 0 and cand * per_n <= budget:
                n_chunk = cand
        return n_chunk, HW
    if HW % LANES != 0:
        # Mosaic requires the last block dim to be a multiple of 128 or the
        # full extent; we cannot chunk an unaligned HW, so bound it instead.
        if per_n > _HARD_SLAB_BYTES:
            # TODO(synk): for huge unaligned spatial extents, switch to a
            # merged (N, G, p*HW) view so the last dim becomes 128-chunkable.
            raise ValueError(
                "g_bn_forward: H*W=%d is not a multiple of 128 and a "
                "single-sample group slab (%d bytes) exceeds the VMEM cap "
                "(%d bytes)" % (HW, per_n, _HARD_SLAB_BYTES))
        return 1, HW
    # HW is lane-aligned: largest multiple-of-128 divisor that fits the budget
    # (floor of 128 keeps the kernel compiling even for tiny budgets).
    d = LANES
    cand = LANES
    while cand <= HW:
        if HW % cand == 0 and p * cand * itemsize <= budget:
            d = cand
        cand += LANES
    return 1, d


# ----------------------------------------------------------------------------
# Fused fast path: grid (G,), block (N, p, HW).  Stats + normalize in one body.
# ----------------------------------------------------------------------------
def _fused_kernel(x_ref, o_ref, *, inv_n, eps, gamma, beta):
    x = x_ref[...].astype(jnp.float32)                  # (N, p, HW)
    s = jnp.sum(x, axis=0, keepdims=True)               # (1, p, HW)  VALU
    s = jnp.sum(s, axis=1, keepdims=True)               # (1, 1, HW)  sublane
    s = jnp.sum(s, axis=2, keepdims=True)               # (1, 1, 1)   lane/XLU
    mean = s * jnp.float32(inv_n)
    xc = x - mean                                       # centered, VMEM-res.
    v = jnp.sum(xc * xc, axis=0, keepdims=True)
    v = jnp.sum(v, axis=1, keepdims=True)
    v = jnp.sum(v, axis=2, keepdims=True)
    var = v * jnp.float32(inv_n)                        # biased (BN training)
    scale = jax.lax.rsqrt(var + jnp.float32(eps)) * jnp.float32(gamma)
    o_ref[...] = (xc * scale + jnp.float32(beta)).astype(o_ref.dtype)


# ----------------------------------------------------------------------------
# Chunked fallback, pass 1: grid (G, K) reduction producing per-group stats.
# ----------------------------------------------------------------------------
def _stats_kernel(x_ref, scale_ref, shift_ref, psum_ref, pssq_ref, *,
                  inv_n, eps, gamma, beta):
    """x_ref: (n_chunk, p, d) tile.  scale/shift: (1, 1) per-group outputs.
    psum/pssq: (1, d) lane-wise partial accumulators in VMEM scratch."""
    k = pl.program_id(1)
    nk = pl.num_programs(1)

    @pl.when(k == 0)
    def _init():
        psum_ref[...] = jnp.zeros_like(psum_ref)
        pssq_ref[...] = jnp.zeros_like(pssq_ref)

    x = x_ref[...].astype(jnp.float32)                     # (nc, p, d)
    row = jnp.sum(x, axis=0)                               # (p, d)  VALU
    row_sq = jnp.sum(x * x, axis=0)                        # (p, d)
    psum_ref[...] += jnp.sum(row, axis=0, keepdims=True)   # (1, d) sublane red
    pssq_ref[...] += jnp.sum(row_sq, axis=0, keepdims=True)

    @pl.when(k == nk - 1)
    def _finalize():
        s = jnp.sum(psum_ref[...], axis=-1, keepdims=True)    # (1, 1)
        ss = jnp.sum(pssq_ref[...], axis=-1, keepdims=True)   # (1, 1)
        mean = s * jnp.float32(inv_n)
        # Single-pass E[x^2] - E[x]^2 with chunked f32 partials; clamp guards
        # tiny negative cancellation.  (Fused path uses true two-pass.)
        var = ss * jnp.float32(inv_n) - mean * mean
        var = jnp.maximum(var, 0.0)
        scale = jax.lax.rsqrt(var + jnp.float32(eps)) * jnp.float32(gamma)
        shift = jnp.float32(beta) - mean * scale
        scale_ref[...] = scale
        shift_ref[...] = shift


# ----------------------------------------------------------------------------
# Chunked fallback, pass 2: y = x * scale[g] + shift[g] on one tile.
# scale_sm / shift_sm are flat (G,) scalar-prefetch refs in SMEM.
# ----------------------------------------------------------------------------
def _norm_kernel(scale_sm, shift_sm, x_ref, o_ref):
    g = pl.program_id(0)
    scale = scale_sm[g]
    shift = shift_sm[g]
    o_ref[...] = (x_ref[...].astype(jnp.float32) * scale + shift).astype(
        o_ref.dtype)


def g_bn_forward(x, p=P_GROUP, *, fused_slab_bytes=_FUSED_SLAB_BYTES,
                 chunk_block_bytes=_CHUNK_BLOCK_BYTES):
    """Pallas implementation of g_bn.forward. x: (N, C, H, W), C % p == 0."""
    N, C, H, W = x.shape
    assert C % p == 0, "channel count must be divisible by p"
    # 32-bit inputs only (sub-32-bit dtypes would need p to match the sublane
    # packing: 16 for bf16, 32 for int8).
    assert x.dtype.itemsize == 4, "g_bn_forward expects a 32-bit dtype"
    # The block's second-minor dim is p: Mosaic needs a multiple of 8 (f32
    # sublane) or the full channel extent.
    assert p % 8 == 0 or p == C, "p must be a multiple of 8 or equal to C"

    G = C // p
    HW = H * W
    M = N * p * HW                           # reduction size per group
    itemsize = x.dtype.itemsize

    x3 = x.reshape(N, C, HW)                 # free view of contiguous NCHW

    slab_bytes = N * p * HW * itemsize
    if slab_bytes <= fused_slab_bytes:
        # --- Fused single-pass fast path: 1 HBM read + 1 HBM write. ---
        fused = functools.partial(_fused_kernel, inv_n=1.0 / M, eps=EPS,
                                  gamma=GAMMA, beta=BETA)
        out3 = pl.pallas_call(
            fused,
            out_shape=jax.ShapeDtypeStruct((N, C, HW), x.dtype),
            grid=(G,),
            in_specs=[pl.BlockSpec((N, p, HW), lambda g: (0, g, 0))],
            out_specs=pl.BlockSpec((N, p, HW), lambda g: (0, g, 0)),
            compiler_params=pltpu.CompilerParams(
                dimension_semantics=("parallel",),
                vmem_limit_bytes=_VMEM_LIMIT_BYTES),
        )(x3)
        return out3.reshape(N, C, H, W)

    # --- Chunked two-pass fallback. ---
    n_chunk, d = _choose_blocks(N, p, HW, itemsize, chunk_block_bytes)
    kn = N // n_chunk
    kd = HW // d
    K = kn * kd

    def block_index(g, k, *_):               # also used with prefetch refs
        return (k // kd, g, k % kd)

    stats_kernel = functools.partial(
        _stats_kernel, inv_n=1.0 / M, eps=EPS, gamma=GAMMA, beta=BETA)

    # Pass 1: per-group scale / shift.
    scale, shift = pl.pallas_call(
        stats_kernel,
        out_shape=(jax.ShapeDtypeStruct((G, 1), jnp.float32),
                   jax.ShapeDtypeStruct((G, 1), jnp.float32)),
        grid=(G, K),
        in_specs=[pl.BlockSpec((n_chunk, p, d), block_index)],
        out_specs=(pl.BlockSpec((1, 1), lambda g, k: (g, 0)),
                   pl.BlockSpec((1, 1), lambda g, k: (g, 0))),
        scratch_shapes=[pltpu.VMEM((1, d), jnp.float32),
                        pltpu.VMEM((1, d), jnp.float32)],
        compiler_params=pltpu.CompilerParams(
            dimension_semantics=("parallel", "arbitrary"),
            vmem_limit_bytes=_VMEM_LIMIT_BYTES),
    )(x3)

    # Flatten to (G,) before scalar prefetch: a 2-D (G,1) SMEM array would pad
    # to [ceil(G/8)*8, 128] words (~512x raw size); 1-D stays a few KiB.
    scale = scale.reshape(G)
    shift = shift.reshape(G)

    # Pass 2: normalize; both grid axes parallel (uses both v7x TensorCores).
    out3 = pl.pallas_call(
        _norm_kernel,
        out_shape=jax.ShapeDtypeStruct((N, C, HW), x.dtype),
        grid_spec=pltpu.PrefetchScalarGridSpec(
            num_scalar_prefetch=2,
            grid=(G, K),
            in_specs=[pl.BlockSpec((n_chunk, p, d), block_index)],
            out_specs=pl.BlockSpec((n_chunk, p, d), block_index),
        ),
        compiler_params=pltpu.CompilerParams(
            dimension_semantics=("parallel", "parallel"),
            vmem_limit_bytes=_VMEM_LIMIT_BYTES),
    )(scale, shift, x3)

    return out3.reshape(N, C, H, W)


def _reference(x, p=P_GROUP):
    """Pure-JAX reference mirroring the PyTorch module."""
    N, C, H, W = x.shape
    G = C // p
    xr = x.reshape(N, G, p * H, W)           # (N, C/p, H*p, W)
    mean = jnp.mean(xr, axis=(0, 2, 3), keepdims=True)
    var = jnp.mean((xr - mean) ** 2, axis=(0, 2, 3), keepdims=True)
    y = (xr - mean) / jnp.sqrt(var + EPS) * GAMMA + BETA
    return y.reshape(N, C, H, W)


if __name__ == "__main__":
    key = jax.random.PRNGKey(0)
    N, C, H, W = 2, 16, 16, 16               # C must be a multiple of p=8
    x = jax.random.normal(key, (N, C, H, W), dtype=jnp.float32)

    ref = _reference(x, p=P_GROUP)

    # 1) Default configuration -> fused single-pass fast path.
    out = jax.block_until_ready(g_bn_forward(x, p=P_GROUP))
    np.testing.assert_allclose(np.asarray(out), np.asarray(ref),
                               rtol=1e-4, atol=1e-4)

    # 2) Force the chunked two-pass path with N-chunking (n_chunk=1, d=HW,
    #    K=2) to exercise init / accumulate / finalize across sample chunks.
    out_n = jax.block_until_ready(
        g_bn_forward(x, p=P_GROUP, fused_slab_bytes=0,
                     chunk_block_bytes=8 * 1024))
    np.testing.assert_allclose(np.asarray(out_n), np.asarray(ref),
                               rtol=1e-4, atol=1e-4)

    # 3) Force HW-chunking (d=128, K=4) to exercise lane-chunked accumulation.
    out_hw = jax.block_until_ready(
        g_bn_forward(x, p=P_GROUP, fused_slab_bytes=0,
                     chunk_block_bytes=4 * 1024))
    np.testing.assert_allclose(np.asarray(out_hw), np.asarray(ref),
                               rtol=1e-4, atol=1e-4)

    print("KERNEL_OK")
</pallas_src>

<mosaic_0001>
module attributes {stable_mosaic.version = 11 : i64} {
  func.func @_fused_kernel(%arg0: i32, %arg1: memref<2x8x256xf32, #tpu.memory_space<vmem>>, %arg2: memref<2x8x256xf32, #tpu.memory_space<vmem>>) attributes {dimension_semantics = [#tpu.dimension_semantics<parallel>], iteration_bounds = array<i64: 2>, scalar_prefetch = 0 : i64, scratch_operands = 0 : i64, tpu.core_type = #tpu.core_type<tc>, window_params = [{transform_indices = @transform_0, window_bounds = array<i64: 2, 8, 256>}, {transform_indices = @transform_1, window_bounds = array<i64: 2, 8, 256>}]} {
    %c0 = arith.constant 0 : index
    %c0_0 = arith.constant 0 : index
    %c0_1 = arith.constant 0 : index
    %0 = vector.load %arg1[%c0, %c0_0, %c0_1] : memref<2x8x256xf32, #tpu.memory_space<vmem>>, vector<2x8x256xf32>
    %cst = arith.constant dense<0.000000e+00> : vector<8x256xf32>
    %1 = vector.multi_reduction <add>, %0, %cst [0] : vector<2x8x256xf32> to vector<8x256xf32>
    %2 = vector.shape_cast %1 : vector<8x256xf32> to vector<1x8x256xf32>
    %cst_2 = arith.constant dense<0.000000e+00> : vector<1x256xf32>
    %3 = vector.multi_reduction <add>, %2, %cst_2 [1] : vector<1x8x256xf32> to vector<1x256xf32>
    %4 = vector.shape_cast %3 : vector<1x256xf32> to vector<1x1x256xf32>
    %cst_3 = arith.constant dense<0.000000e+00> : vector<1x1xf32>
    %5 = vector.multi_reduction <add>, %4, %cst_3 [2] : vector<1x1x256xf32> to vector<1x1xf32>
    %6 = vector.shape_cast %5 : vector<1x1xf32> to vector<1x1x1xf32>
    %cst_4 = arith.constant 2.44140625E-4 : f32
    %7 = vector.broadcast %cst_4 : f32 to vector<1x1x1xf32>
    %8 = arith.mulf %6, %7 : vector<1x1x1xf32>
    %9 = vector.broadcast %8 : vector<1x1x1xf32> to vector<2x8x256xf32>
    %10 = arith.subf %0, %9 : vector<2x8x256xf32>
    %11 = arith.mulf %10, %10 : vector<2x8x256xf32>
    %cst_5 = arith.constant dense<0.000000e+00> : vector<8x256xf32>
    %12 = vector.multi_reduction <add>, %11, %cst_5 [0] : vector<2x8x256xf32> to vector<8x256xf32>
    %13 = vector.shape_cast %12 : vector<8x256xf32> to vector<1x8x256xf32>
    %cst_6 = arith.constant dense<0.000000e+00> : vector<1x256xf32>
    %14 = vector.multi_reduction <add>, %13, %cst_6 [1] : vector<1x8x256xf32> to vector<1x256xf32>
    %15 = vector.shape_cast %14 : vector<1x256xf32> to vector<1x1x256xf32>
    %cst_7 = arith.constant dense<0.000000e+00> : vector<1x1xf32>
    %16 = vector.multi_reduction <add>, %15, %cst_7 [2] : vector<1x1x256xf32> to vector<1x1xf32>
    %17 = vector.shape_cast %16 : vector<1x1xf32> to vector<1x1x1xf32>
    %cst_8 = arith.constant 2.44140625E-4 : f32
    %18 = vector.broadcast %cst_8 : f32 to vector<1x1x1xf32>
    %19 = arith.mulf %17, %18 : vector<1x1x1xf32>
    %cst_9 = arith.constant 9.99999974E-6 : f32
    %20 = vector.broadcast %cst_9 : f32 to vector<1x1x1xf32>
    %21 = arith.addf %19, %20 : vector<1x1x1xf32>
    %22 = math.rsqrt %21 : vector<1x1x1xf32>
    %cst_10 = arith.constant 1.000000e+00 : f32
    %23 = vector.broadcast %cst_10 : f32 to vector<1x1x1xf32>
    %24 = arith.mulf %22, %23 : vector<1x1x1xf32>
    %25 = vector.broadcast %24 : vector<1x1x1xf32> to vector<2x8x256xf32>
    %26 = arith.mulf %10, %25 : vector<2x8x256xf32>
    %cst_11 = arith.constant 0.000000e+00 : f32
    %27 = vector.broadcast %cst_11 : f32 to vector<2x8x256xf32>
    %28 = arith.addf %26, %27 : vector<2x8x256xf32>
    %c0_12 = arith.constant 0 : index
    %c0_13 = arith.constant 0 : index
    %c0_14 = arith.constant 0 : index
    %29 = vector.load %arg2[%c0_12, %c0_13, %c0_14] : memref<2x8x256xf32, #tpu.memory_space<vmem>>, vector<2x8x256xf32>
    tpu.vector_store %arg2[%c0_12, %c0_13, %c0_14], %28 {strides = array<i32>} : memref<2x8x256xf32, #tpu.memory_space<vmem>>, vector<2x8x256xf32>,
    return
  }
  func.func @transform_0(%arg0: i32) -> (i32, i32, i32) {
    %c0_i32 = arith.constant 0 : i32
    %c0_i32_0 = arith.constant 0 : i32
    %c0_i32_1 = arith.constant 0 : i32
    return %c0_i32, %arg0, %c0_i32_0 : i32, i32, i32
  }
  func.func @transform_1(%arg0: i32) -> (i32, i32, i32) {
    %c0_i32 = arith.constant 0 : i32
    %c0_i32_0 = arith.constant 0 : i32
    %c0_i32_1 = arith.constant 0 : i32
    return %c0_i32, %arg0, %c0_i32_0 : i32, i32, i32
  }
}

</mosaic_0001>

<bundles_post_ra>
// kernel: tpu_custom_call.1
= control target key start
LH: loop header
LB: loop body
LE: loop exit
PB: predicated region body
PF: predicated region fallthrough
CT: control target
= control target key end

     0   :  { %6 = vsyncpa [#allocation3], 0  ;;  %s626_s0 = inlined_call_operand.hbm [shape: f32[2,16,256], index: 0, kind: input, shape index: {}]   ;;  %s627_s1 = inlined_call_operand.hbm [shape: f32[2,16,256], index: 1, kind: output, shape index: {}]  }
   0x1   :  { %8 = vsyncpa [#allocation3 + $0x1], 0 }
   0x2   :  { %9 = vsyncpa [#allocation4], 0 }
   0x3   :  { %11 = vsyncpa [#allocation4 + $0x1], 0  ;;  %s466_s6 = smov 0   ;;  %s468_s7 = smov 0  }
   0x4   :  { %s470_s8 = smov 0   ;;  %s472_s9 = smov 0  }
   0x5 LB: > { %s487_s10 = sadd.s32 4294967295, %s446_s9   ;;  %s284_s11 = sadd.s32 4294967294, %s446_s9   ;;  %s446_s9 = sphi %s472_s9, %s643_s9   ;;  %s442_s8 = sphi %s470_s8, %s642_s8   ;;  %s438_s7 = sphi %s468_s7, %s641_s7   ;;  %s434_s6 = sphi %s466_s6, %s640_s6  }
   0x6   : > { %s491_s12 = sadd.s32 1, %s446_s9   ;;  %s24_s13 = sadd.s32 1, %s442_s8 }
   0x7   : > { %s21_s14 = ssub.s32 %s446_s9, %s491_s12  ;;  %p31_p0 = scmp.ne.s32.totalorder %s442_s8, %s438_s7 }
   0x8   : > { %p22_p1 = scmp.eq.s32.totalorder %s21_s14, 0  ;;  %p32_p2 = scmp.eq.s32.totalorder %s446_s9, 0 }
   0x9   : > { %p37_p3 = scmp.ne.s32.totalorder %s438_s7, %s434_s6  ;;  %p38_p4 = scmp.eq.s32.totalorder %s487_s10, 0 }
   0xa   : > { %s503_s15 = scalar_select %p22_p1, %s442_s8, %s24_s13  }
   0xb   : > { %p505_p5 = por %p32_p2, %p31_p0  ;;  %p509_p6 = por %p38_p4, %p37_p3 }
   0xc   : > { %p61_p7 = scmp.eq.s32.totalorder %s487_s10, 1  ;;  %p67_p8 = scmp.eq.s32.totalorder %s284_s11, 1 }
   0xd   : > { %s631_s17 = scalar_select %p509_p6, 1, 0 }
   0xe   : > { %p312_p10 = scmp.lt.s32.totalorder %s446_s9, 2  ;;  %p516_p11 = por %p61_p7, %p31_p0 }
   0xf   : > { %p520_p12 = por %p67_p8, %p37_p3  ;;  %s87_s20 = sand.u32 1, %s442_s8  }
  0x10   : > { %s632_s18 = scalar_select %p516_p11, 1, 0 }
  0x11   : > { %s633_s19 = scalar_select %p520_p12, 1, 0 }
  0x12   : > { %s298_s21 = sshll.u32 %s446_s9, 8  ;;  %s287_s22 = sshll.u32 %s87_s20, 5 }
  0x13   : > { %s529_s25 = scalar_lea.hbm %s626_s0, %s298_s21  ;;  %s91_s26 = scalar_lea.vmem [#allocation2], %s287_s22 }
  0x14   : > { %s98_s27 = sshll.u32 %s91_s26, 4  ;;  %p533_p13 = pnand %p312_p10, %p505_p5  ;;  %s537_s27 = int_to_ptr.vmem [resolvable:$true] %s98_s27 }
  0x15   : > { %s540_s29 = scalar_lea.sflag [#allocation3], %s87_s20  ;;  %s354_s30 = scalar_lea.hbm %s529_s25, 512 }
  0x16   : > { %p355_p1 = scmp.ne.s32.totalorder %s529_s25, %s354_s30  ;;  %p356_p2 = pneg %p533_p13 }
  0x17   : > { %s359_s4 = scalar_lea.hbm %s626_s0, 1024  ;;  %p360_p5 = scmp.lt.s32.totalorder %s529_s25, %s626_s0 }
  0x18   : > { %p357_p3 = pnand %p356_p2, %p355_p1  ;;  %p361_p7 = scmp.lt.s32.totalorder %s359_s4, %s354_s30 }
  0x1a   : > { %p358_p4 = pneg %p357_p3  ;;  %p362_p8 = por %p361_p7, %p360_p5 }
  0x1c   : > { %p363_p10 = pnand %p362_p8, %p358_p4 }
  0x1e   : > { %366 = shalt.err (!%p363_p10)
}
  0x1f   : > { %s367_s13 = scalar_lea.vmem %s537_s27, 512  ;;  %s448_s14 = smov [#allocation2]  }
  0x20   : > { %p368_p9 = scmp.ne.s32.totalorder %s537_s27, %s367_s13  ;;  %s372_s16 = sshll.u32 %s448_s14, 4  ;;  %s373_s16 = int_to_ptr.vmem [resolvable:$false] %s372_s16 }
  0x21   : > { %s374_s20 = scalar_lea.vmem %s373_s16, 1024  ;;  %p375_p3 = scmp.lt.s32.totalorder %s537_s27, %s373_s16 }
  0x22   : > { %p370_p0 = pnand %p368_p9, %p356_p2  ;;  %p376_p12 = scmp.lt.s32.totalorder %s374_s20, %s367_s13 }
  0x24   : > { %p371_p1 = pneg %p370_p0  ;;  %p377_p11 = por %p376_p12, %p375_p3 }
  0x26   : > { %p378_p6 = pnand %p377_p11, %p371_p1 }
  0x28   : > { %381 = shalt.err (!%p378_p6)
}
  0x29   : > { %s449_s21 = smov 512   ;;  %s450_s22 = smov 256  }
  0x2a   : > { %s451_s23 = smov 16   ;;  %p106_p9 = scmp.lt.s32.totalorder %s446_s9, 3 }
  0x2b   : > { %307 = dma.hbm_to_vmem [thread:$0]  (!%p533_p13), %s529_s25, 512, %s537_s27, %s540_s29, %s449_s21, %s450_s22, %s451_s23  }
  0x2c   : > { %p635_p0 = scmp.ge.s32.totalorder %s446_s9, 1 }
  0x2e   : > { %p107_p2 = pnand %p635_p0, %p106_p9 }
  0x2f   : > { %s565_s24 = sand.u32 (!%p107_p2), 1, %s438_s7   ;;  %p636_p6 = scmp.ne.s32.totalorder (!%p107_p2), %s631_s17, 0 }
  0x30   : > { %110 = sbr.rel (%p107_p2) target bundleno = 406 (0x196), region = 24  ;;  %s291_s26 = sshll.u32 (!%p107_p2), %s565_s24, 5 }
  0x31   : > { %s113_s30 = scalar_lea.sflag (!%p107_p2), [#allocation3], %s565_s24  ;;  %s116_s2 = scalar_lea.vmem (!%p107_p2), [#allocation2], %s291_s26 }
  0x35   : > { %425 = dma.done.wait (%p636_p6), %s113_s30, 512  }
  0x36   : > { %427 = vsyncadd (%p636_p6), %s113_s30, 4294966784  ;;  %v135_v0 = vld [vmem:[%s116_s2] sm:$0xff]  ;;  %v136_v1 = vld [vmem:[%s116_s2 + $0x8] sm:$0xff]  ;;  %s299_s17 = sshll.u32 %s487_s10, 8  ;;  %s134_s25 = scalar_lea.vmem [#allocation5], %s291_s26 }
  0x37   : > { %v137_v2 = vld [vmem:[%s116_s2 + $0x10] sm:$0xff]  ;;  %v138_v3 = vld [vmem:[%s116_s2 + $0x18] sm:$0xff]  ;;  %s211_s27 = sshll.u32 %s134_s25, 4  ;;  %s581_s3 = scalar_lea.hbm %s627_s1, %s299_s17  ;;  %s583_s27 = int_to_ptr.vmem [resolvable:$true] %s211_s27 }
  0x38   : > { %v139_v4 = vadd.f32 %v137_v2, %v135_v0  ;;  %v140_v5 = vadd.f32 %v138_v3, %v136_v1  ;;  %s198_s10 = scalar_lea.sflag [#allocation4], %s565_s24  ;;  %s382_s4 = scalar_lea.vmem %s583_s27, 512 }
  0x39   : > { %p383_p11 = scmp.ne.s32.totalorder %s583_s27, %s382_s4  ;;  %p637_p12 = scmp.ne.s32.totalorder %s632_s18, 0 }
  0x3a   : > { %v141_v6 = vrot.slane %v139_v4, 4  ;;  %v147_v7 = vrot.slane %v140_v5, 4  ;;  %s452_s5 = smov [#allocation5]  }
  0x3b   : > { %p384_p13 = pnand %p383_p11, %p637_p12  ;;  %s386_s11 = sshll.u32 %s452_s5, 4  ;;  %s387_s11 = int_to_ptr.vmem [resolvable:$false] %s386_s11 }
  0x3c   : > { %v142_v8 = vadd.f32 %v141_v6, %v139_v4  ;;  %v148_v9 = vadd.f32 %v147_v7, %v140_v5  ;;  %s388_s13 = scalar_lea.vmem %s387_s11, 1024  ;;  %p389_p5 = scmp.lt.s32.totalorder %s583_s27, %s387_s11 }
  0x3d   : > { %p385_p4 = pneg %p384_p13  ;;  %p390_p7 = scmp.lt.s32.totalorder %s388_s13, %s382_s4 }
  0x3e   : > { %v143_v10 = vrot.slane %v142_v8, 2  ;;  %v149_v11 = vrot.slane %v148_v9, 2 }
  0x3f   : > { %p391_p8 = por %p390_p7, %p389_p5 }
  0x40   : > { %v144_v12 = vadd.f32 %v143_v10, %v142_v8  ;;  %v150_v13 = vadd.f32 %v149_v11, %v148_v9 }
  0x41   : > { %p392_p10 = pnand %p391_p8, %p385_p4 }
  0x42   : > { %v145_v14 = vrot.slane %v144_v12, 1  ;;  %v151_v15 = vrot.slane %v150_v13, 1 }
  0x44   : > { %v146_v16 = vadd.f32 %v145_v14, %v144_v12  ;;  %v152_v17 = vadd.f32 %v151_v15, %v150_v13 }
  0x46   : > { %v153_v18 = vadd.f32 %v152_v17, %v146_v16 }
  0x48   : > { %154 = vadd.xlane.f32.xlu0 %v153_v18 }
  0xd1   : > { %v155_v19 = vpop.xlane.xlu0 %154 }
  0xd2   : > { %v156_v20 = vmul.f32 0.00024414063, %v155_v19 }
  0xd4   : > { %v157_v21 = vsub.f32 %v135_v0, %v156_v20  ;;  %v158_v22 = vsub.f32 %v136_v1, %v156_v20  ;;  %v159_v23 = vsub.f32 %v137_v2, %v156_v20  ;;  %v160_v24 = vsub.f32 %v138_v3, %v156_v20 }
  0xd6   : > { %v161_v25 = vmul.f32 %v157_v21, %v157_v21  ;;  %v162_v26 = vmul.f32 %v158_v22, %v158_v22  ;;  %v163_v27 = vmul.f32 %v159_v23, %v159_v23  ;;  %v164_v28 = vmul.f32 %v160_v24, %v160_v24 }
  0xd8   : > { %v165_v29 = vadd.f32 %v163_v27, %v161_v25  ;;  %v166_v30 = vadd.f32 %v164_v28, %v162_v26 }
  0xda   : > { %v167_v31 = vrot.slane %v165_v29, 4  ;;  %v173_v32 = vrot.slane %v166_v30, 4 }
  0xdc   : > { %v168_v33 = vadd.f32 %v167_v31, %v165_v29  ;;  %v174_v34 = vadd.f32 %v173_v32, %v166_v30 }
  0xde   : > { %v169_v35 = vrot.slane %v168_v33, 2  ;;  %v175_v36 = vrot.slane %v174_v34, 2 }
  0xe0   : > { %v170_v37 = vadd.f32 %v169_v35, %v168_v33  ;;  %v176_v38 = vadd.f32 %v175_v36, %v174_v34 }
  0xe2   : > { %v171_v39 = vrot.slane %v170_v37, 1  ;;  %v177_v40 = vrot.slane %v176_v38, 1 }
  0xe4   : > { %v172_v41 = vadd.f32 %v171_v39, %v170_v37  ;;  %v178_v42 = vadd.f32 %v177_v40, %v176_v38 }
  0xe6   : > { %v179_v43 = vadd.f32 %v178_v42, %v172_v41 }
  0xe8   : > { %180 = vadd.xlane.f32.xlu0 %v179_v43 }
 0x171   : > { %v181_v44 = vpop.xlane.xlu0 %180 }
 0x172   : > { %v182_v45 = vmul.f32 0.00024414063, %v181_v44 }
 0x174   : > { %v183_v46 = vadd.f32 1e-05, %v182_v45 }
 0x176   : > { %352 = vrsqrt.f32 %v183_v46 }
 0x183   : > { %v353_v47 = vpop.eup %352 }
 0x184   : > { %v185_v48 = vmul.f32 %v353_v47, %v157_v21  ;;  %v186_v49 = vmul.f32 %v353_v47, %v158_v22  ;;  %v187_v50 = vmul.f32 %v353_v47, %v159_v23  ;;  %v188_v51 = vmul.f32 %v353_v47, %v160_v24 }
 0x186   : > { %193 = vst [vmem:[%s134_s25] sm:$0xff] %v185_v48  ;;  %194 = vst [vmem:[%s134_s25 + $0x8] sm:$0xff] %v186_v49 }
 0x187   : > { %195 = vst [vmem:[%s134_s25 + $0x10] sm:$0xff] %v187_v50  ;;  %196 = vst [vmem:[%s134_s25 + $0x18] sm:$0xff] %v188_v51 }
 0x188   : > { %395 = shalt.err (!%p392_p10)
}
 0x189   : > { %s396_s14 = scalar_lea.hbm %s581_s3, 512  ;;  %s400_s21 = scalar_lea.hbm %s627_s1, 1024 }
 0x18a   : > { %p397_p1 = scmp.ne.s32.totalorder %s581_s3, %s396_s14  ;;  %p401_p0 = scmp.lt.s32.totalorder %s581_s3, %s627_s1 }
 0x18b   : > { %p402_p2 = scmp.lt.s32.totalorder %s400_s21, %s396_s14 }
 0x18c   : > { %p398_p3 = pnand %p397_p1, %p637_p12 }
 0x18d   : > { %p403_p6 = por %p402_p2, %p401_p0 }
 0x18e   : > { %p399_p9 = pneg %p398_p3 }
 0x190   : > { %p404_p11 = pnand %p403_p6, %p399_p9 }
 0x192   : > { %407 = shalt.err (!%p404_p11)
}
 0x193   : > { %s453_s26 = smov 256   ;;  %s454_s30 = smov 512  }
 0x194   : > { %s455_s2 = smov 16  }
 0x195   : > { %302 = dma.vmem_to_hbm [thread:$0]  (%p637_p12), %s583_s27, 512, %s581_s3, %s198_s10, %s453_s26, %s454_s30, %s455_s2  }
 0x196 PF: > { %s226_s17 = sand.u32 1, %s434_s6   ;;  %p638_p13 = scmp.ne.s32.totalorder %s633_s19, 0 }
 0x197   : > { %p639_p4 = scmp.ge.s32.totalorder %s446_s9, 2  ;;  %s227_s25 = scalar_lea.sflag [#allocation4], %s226_s17 }
 0x199   : > { %p309_p5 = pnand %p639_p4, %p638_p13 }
 0x19b   : > { %p310_p7 = pneg %p309_p5 }
 0x19d   : > { %429 = dma.done.wait (%p310_p7), %s227_s25, 512  }
 0x19e   : > { %431 = vsyncadd (%p310_p7), %s227_s25, 4294966784  ;;  %p14_p8 = scmp.ge.s32.totalorder %s491_s12, 4   ;;  %s640_s6 = smov %s438_s7 }
 0x19f   : > { %s641_s7 = smov %s442_s8  ;;  %s642_s8 = smov %s503_s15 }
 0x1a0   : > { %s643_s9 = smov %s491_s12  ;;  %16 = sbr.rel (!%p14_p8) target bundleno = 5 (0x5), region = 69 }
 0x1a5   :  { %232 = vsyncpa [#allocation3], 1 }
 0x1a6   :  { %234 = vsyncpa [#allocation3 + $0x1], 1 }
 0x1a7   :  { %235 = vsyncpa [#allocation4], 1 }
 0x1a8   :  { %237 = vsyncpa [#allocation4 + $0x1], 1 }

</bundles_post_ra>
